<compile_context>
chip_gen: v7x
topology: tpu7x:2x2x1
jax: 0.10.0
libtpu: 0.0.40
codegen_flags: <defaults>
</compile_context>

<pallas_src>
import functools
import math

import jax
import jax.numpy as jnp
from jax.experimental import pallas as pl
from jax.experimental.pallas import tpu as pltpu


def staae_encoder_kernel(x_ref, w1_ref, b1_ref, w2_ref, b2_ref,
                         wqkv_ref, bqkv_ref, o_ref, acc_ref,
                         *, groups, seq, d_head, scale):
    """One (row_tile, k_tile) grid step.

    Grid = (row_tiles, k_tiles). k (axis 1, innermost, "arbitrary") streams
    W1 over d_vol into the f32 accumulator; the last k step runs the rest of
    the network and stores the output tile.
    """
    k = pl.program_id(1)

    @pl.when(k == 0)
    def _init():
        acc_ref[...] = jnp.zeros_like(acc_ref)

    # Layer-1 partial product for this K slice.  x and W1 are already in the
    # same (bf16 or f32) dtype — no per-step VPU cast — MXU accumulates in f32.
    acc_ref[...] += jnp.dot(x_ref[...], w1_ref[...],
                            preferred_element_type=jnp.float32)

    @pl.when(k == pl.num_programs(1) - 1)
    def _finalize():
        # Reuse the accumulator for h1: saves a (row_tile, d_emd1) f32 temp
        # of peak VMEM in the epilogue.
        acc_ref[...] = jnp.tanh(acc_ref[...] + b1_ref[...])
        h1 = acc_ref[...]

        h2 = jnp.tanh(
            jnp.dot(h1.astype(w2_ref.dtype), w2_ref[...],
                    preferred_element_type=jnp.float32) + b2_ref[...])

        # Fused QKV projection: one (rows, 3*d_head) matmul instead of three
        # narrow N=64 ones.  Each head is padded to a 128-lane multiple so the
        # slices below are lane-aligned; padded lanes are zero and do not
        # change scores or context.
        qkv = jnp.dot(h2.astype(wqkv_ref.dtype), wqkv_ref[...],
                      preferred_element_type=jnp.float32) + bqkv_ref[...]

        rows = qkv.shape[0]
        q = qkv[:, 0 * d_head:1 * d_head].reshape(groups, seq, d_head)
        kk = qkv[:, 1 * d_head:2 * d_head].reshape(groups, seq, d_head)
        v = qkv[:, 2 * d_head:3 * d_head].reshape(groups, seq, d_head)

        # Per-batch scaled dot-product attention, batched over the `groups`
        # batch elements packed into this row tile (no k^T materialisation).
        scores = jax.lax.dot_general(
            q, kk, (((2,), (2,)), ((0,), (0,))),
            preferred_element_type=jnp.float32) * scale
        scores = scores - jnp.max(scores, axis=-1, keepdims=True)   # stable
        e = jnp.exp(scores)
        # Exact reciprocal: runs once per row tile, cost is negligible and it
        # removes the approx-rsqrt error flagged in review.
        p = e * pl.reciprocal(jnp.sum(e, axis=-1, keepdims=True), approx=False)
        ctx = jax.lax.dot_general(
            p, v, (((2,), (1,)), ((0,), (0,))),
            preferred_element_type=jnp.float32)

        # Lane-dense (rows, d_head=128k) store; wrapper slices off pad lanes.
        o_ref[...] = ctx.reshape(rows, d_head).astype(o_ref.dtype)


def _round_up(n, m):
    return (n + m - 1) // m * m


def _pick_groups_per_tile(nbatch, seq, max_rows, sublane):
    """Number of whole batch elements per row tile.

    Prefers (a) the sublane multiple (16 for bf16, 8 for f32), (b) at least
    two row tiles so the "parallel" grid axis can feed both v7x TensorCores,
    (c) the largest tile that fits `max_rows`.  Falls back to a single
    full-row block (exempt from the (8,128) rule) only if nothing else is
    legal.
    """
    cap = min(nbatch, max(1, max_rows // seq))
    for mult in (sublane, 8):
        cands = [g for g in range(cap, 0, -1)
                 if nbatch % g == 0 and (g * seq) % mult == 0]
        if not cands:
            continue
        multi = [g for g in cands if nbatch // g >= 2]
        if multi:
            return multi[0]
        if nbatch == 1:
            return cands[0]
    return nbatch


def _pick_k_tile(d_vol, max_k_tile):
    """K tile (multiple of 128) that divides round_up(d_vol, 128) exactly, so
    K padding never exceeds the 128-lane round-up (no dead DMA traffic)."""
    d128 = _round_up(d_vol, 128)
    if d128 <= max_k_tile:
        return d128, d128
    for t in range(max_k_tile - max_k_tile % 128, 127, -128):
        if d128 % t == 0:
            return t, d128
    return max_k_tile, _round_up(d_vol, max_k_tile)


def _default_vmem_limit():
    """7/8 of the chip's VMEM: ~112 MiB on v5e/v6e, ~56 MiB on v7x (leaves
    headroom instead of the old hard 64 MiB that equals all of v7x VMEM)."""
    try:
        cap = int(pltpu.get_tpu_info().vmem_capacity_bytes)
        return cap * 7 // 8
    except Exception:
        return 48 * 1024 * 1024   # conservative fallback (safe on v7x)


def staae_encoder(x, params, *, max_rows_per_tile=1024, max_k_tile=2048,
                  use_bf16=True, vmem_limit_bytes=None, input_buffering=2):
    """x: (B, S, d_vol) float32 -> (B, S, d_latent) float32."""
    B, S, d_vol = x.shape
    w1, b1, w2, b2, wq, bq, wk, bk, wv, bv = params
    d_emd1, d_emd2, d_latent = w1.shape[1], w2.shape[1], wq.shape[1]

    # ---- QKV fusion (+ pad each head to a multiple of 128 lanes). ----
    d_head = _round_up(d_latent, 128)
    pad_n = lambda a: jnp.pad(a, ((0, 0), (0, d_head - d_latent)))
    wqkv = jnp.concatenate([pad_n(wq), pad_n(wk), pad_n(wv)], axis=1)
    bqkv = jnp.concatenate([pad_n(bq), pad_n(bk), pad_n(bv)], axis=1)

    # ---- bf16 weights AND bf16 x (f32 accumulation on the MXU). ----
    wdt = jnp.bfloat16 if use_bf16 else jnp.float32
    w1c, w2c, wqkvc = w1.astype(wdt), w2.astype(wdt), wqkv.astype(wdt)

    # ---- Row tiling: flatten (B, S); pack whole batches per row tile. ----
    sublane = 16 if use_bf16 else 8          # bf16 packs 16 rows per vreg
    groups = _pick_groups_per_tile(B, S, max_rows_per_tile, sublane)
    row_tile = groups * S
    num_row_tiles = B // groups

    # ---- K tiling of W1 over d_vol. ----
    k_tile, d_pad = _pick_k_tile(d_vol, max_k_tile)
    num_k = d_pad // k_tile

    # Reshape + pad + cast of x in one traced expression: under jit this
    # fuses into a single HBM pass (no separate full-size pad copy), and
    # bf16 halves the dominant x HBM stream / VMEM buffers.
    x2 = x.reshape(B * S, d_vol)
    if d_pad != d_vol:
        x2 = jnp.pad(x2, ((0, 0), (0, d_pad - d_vol)))
        w1c = jnp.pad(w1c, ((0, d_pad - d_vol), (0, 0)))
    x2 = x2.astype(wdt)

    kernel = functools.partial(
        staae_encoder_kernel,
        groups=groups, seq=S, d_head=d_head, scale=1.0 / math.sqrt(d_latent))

    if vmem_limit_bytes is None:
        vmem_limit_bytes = _default_vmem_limit()

    def stream_spec(shape, index_map):
        # Deeper buffering only on request (when a profile shows exposed DMA).
        if input_buffering > 2:
            return pl.BlockSpec(shape, index_map,
                                pipeline_mode=pl.Buffered(input_buffering))
        return pl.BlockSpec(shape, index_map)

    const_spec = lambda a: pl.BlockSpec(a.shape, lambda r, k: (0, 0))

    out2 = pl.pallas_call(
        kernel,
        out_shape=jax.ShapeDtypeStruct((B * S, d_head), jnp.float32),
        grid_spec=pltpu.PrefetchScalarGridSpec(
            num_scalar_prefetch=0,
            grid=(num_row_tiles, num_k),                  # K (reduction) innermost
            in_specs=[
                stream_spec((row_tile, k_tile), lambda r, k: (r, k)),  # x rows
                stream_spec((k_tile, d_emd1), lambda r, k: (k, 0)),    # W1 stream
                const_spec(b1),
                const_spec(w2c), const_spec(b2),
                const_spec(wqkvc), const_spec(bqkv),
            ],
            out_specs=pl.BlockSpec((row_tile, d_head), lambda r, k: (r, 0)),
            scratch_shapes=[pltpu.VMEM((row_tile, d_emd1), jnp.float32)],
        ),
        compiler_params=pltpu.CompilerParams(
            dimension_semantics=("parallel", "arbitrary"),
            vmem_limit_bytes=vmem_limit_bytes),
    )(x2, w1c, b1, w2c, b2, wqkvc, bqkv)

    # Drop the lane padding and restore (B, S, d_latent).
    return out2[:, :d_latent].reshape(B, S, d_latent)


def _init_linear(key, d_in, d_out):
    """PyTorch nn.Linear-style init: U(-1/sqrt(d_in), 1/sqrt(d_in))."""
    kw, kb = jax.random.split(key)
    bound = 1.0 / math.sqrt(d_in)
    w = jax.random.uniform(kw, (d_in, d_out), jnp.float32, -bound, bound)
    b = jax.random.uniform(kb, (1, d_out), jnp.float32, -bound, bound)
    return w, b


def _reference(x, params):
    """Pure-JAX f32 reference replicating the PyTorch forward."""
    w1, b1, w2, b2, wq, bq, wk, bk, wv, bv = params
    h1 = jnp.tanh(x @ w1 + b1)
    h2 = jnp.tanh(h1 @ w2 + b2)
    q = h2 @ wq + bq
    k = h2 @ wk + bk
    v = h2 @ wv + bv
    scores = jnp.einsum("bqd,bkd->bqk", q, k) / math.sqrt(q.shape[-1])
    p = jax.nn.softmax(scores, axis=-1)
    return jnp.einsum("bqk,bkd->bqd", p, v)


if __name__ == "__main__":
    # Small shapes consistent with the module (downsized from 28549/512/128/64).
    B, S = 4, 8
    d_vol, d_emd1, d_emd2, d_latent = 384, 256, 128, 64

    root = jax.random.PRNGKey(0)
    kx, k1, k2, kq, kk_, kv = jax.random.split(root, 6)

    x = jax.random.normal(kx, (B, S, d_vol), jnp.float32)
    w1, b1 = _init_linear(k1, d_vol, d_emd1)
    w2, b2 = _init_linear(k2, d_emd1, d_emd2)
    wq, bq = _init_linear(kq, d_emd2, d_latent)
    wk, bk = _init_linear(kk_, d_emd2, d_latent)
    wv, bv = _init_linear(kv, d_emd2, d_latent)
    params = (w1, b1, w2, b2, wq, bq, wk, bk, wv, bv)

    ref = _reference(x, params)

    # Small tiles so the demo exercises both grid axes: 2 row tiles of 16 rows
    # (2 batch elements each) and 3 K steps over d_vol.
    tile_kwargs = dict(max_rows_per_tile=16, max_k_tile=128)

    # 1) Exact-math config (f32 x + weights): tight check against the f32
    #    reference (only the K-split accumulation order differs).
    run_f32 = jax.jit(functools.partial(staae_encoder, use_bf16=False,
                                        **tile_kwargs))
    out_f32 = jax.block_until_ready(run_f32(x, params))
    assert out_f32.shape == (B, S, d_latent), out_f32.shape
    err_f32 = float(jnp.max(jnp.abs(out_f32 - ref)))
    assert err_f32 < 2e-3, err_f32

    # 2) Performance config (bf16 x + weights, f32 accumulation): looser check.
    run_bf16 = jax.jit(functools.partial(staae_encoder, use_bf16=True,
                                         **tile_kwargs))
    out_bf16 = jax.block_until_ready(run_bf16(x, params))
    assert out_bf16.shape == (B, S, d_latent), out_bf16.shape
    err_bf16 = float(jnp.max(jnp.abs(out_bf16 - ref)))
    assert err_bf16 < 6e-2, err_bf16

    print("KERNEL_OK")
</pallas_src>

<mosaic_0001>
module attributes {stable_mosaic.version = 11 : i64} {
  func.func @staae_encoder_kernel(%arg0: i32, %arg1: i32, %arg2: memref<16x128xf32, #tpu.memory_space<vmem>>, %arg3: memref<128x256xf32, #tpu.memory_space<vmem>>, %arg4: memref<1x256xf32, #tpu.memory_space<vmem>>, %arg5: memref<256x128xf32, #tpu.memory_space<vmem>>, %arg6: memref<1x128xf32, #tpu.memory_space<vmem>>, %arg7: memref<128x384xf32, #tpu.memory_space<vmem>>, %arg8: memref<1x384xf32, #tpu.memory_space<vmem>>, %arg9: memref<16x128xf32, #tpu.memory_space<vmem>>, %arg10: memref<16x256xf32, #tpu.memory_space<vmem>>) attributes {dimension_semantics = [#tpu.dimension_semantics<parallel>, #tpu.dimension_semantics<arbitrary>], iteration_bounds = array<i64: 2, 3>, scalar_prefetch = 0 : i64, scratch_operands = 1 : i64, tpu.core_type = #tpu.core_type<tc>, window_params = [{transform_indices = @transform_0, window_bounds = array<i64: 16, 128>}, {transform_indices = @transform_1, window_bounds = array<i64: 128, 256>}, {pipeline_mode = #tpu.pipeline_mode<synchronous>, transform_indices = @transform_2, window_bounds = array<i64: 1, 256>}, {pipeline_mode = #tpu.pipeline_mode<synchronous>, transform_indices = @transform_3, window_bounds = array<i64: 256, 128>}, {pipeline_mode = #tpu.pipeline_mode<synchronous>, transform_indices = @transform_4, window_bounds = array<i64: 1, 128>}, {pipeline_mode = #tpu.pipeline_mode<synchronous>, transform_indices = @transform_5, window_bounds = array<i64: 128, 384>}, {pipeline_mode = #tpu.pipeline_mode<synchronous>, transform_indices = @transform_6, window_bounds = array<i64: 1, 384>}, {transform_indices = @transform_7, window_bounds = array<i64: 16, 128>}]} {
    %c0_i32 = arith.constant 0 : i32
    %0 = arith.cmpi eq, %arg1, %c0_i32 : i32
    %1 = arith.extui %0 : i1 to i32
    %c0_i32_0 = arith.constant 0 : i32
    %2 = arith.cmpi ne, %1, %c0_i32_0 : i32
    scf.if %2 {
      %cst_9 = arith.constant 0.000000e+00 : f32
      %12 = vector.broadcast %cst_9 : f32 to vector<16x256xf32>
      %c0_10 = arith.constant 0 : index
      %c0_11 = arith.constant 0 : index
      %13 = vector.load %arg10[%c0_10, %c0_11] : memref<16x256xf32, #tpu.memory_space<vmem>>, vector<16x256xf32>
      tpu.vector_store %arg10[%c0_10, %c0_11], %12 {strides = array<i32>} : memref<16x256xf32, #tpu.memory_space<vmem>>, vector<16x256xf32>,
    } else {
    }
    %c0 = arith.constant 0 : index
    %c0_1 = arith.constant 0 : index
    %3 = vector.load %arg10[%c0, %c0_1] : memref<16x256xf32, #tpu.memory_space<vmem>>, vector<16x256xf32>
    %c0_2 = arith.constant 0 : index
    %c0_3 = arith.constant 0 : index
    %4 = vector.load %arg2[%c0_2, %c0_3] : memref<16x128xf32, #tpu.memory_space<vmem>>, vector<16x128xf32>
    %c0_4 = arith.constant 0 : index
    %c0_5 = arith.constant 0 : index
    %5 = vector.load %arg3[%c0_4, %c0_5] : memref<128x256xf32, #tpu.memory_space<vmem>>, vector<128x256xf32>
    %cst = arith.constant dense<0.000000e+00> : vector<16x256xf32>
    %6 = tpu.matmul %4, %5, %cst {dimension_numbers = #tpu.dot_dimension_numbers<[1], [0], [0], [1], [0, 0, 1, 1], [], []>} : vector<16x128xf32>, vector<128x256xf32>, vector<16x256xf32> -> vector<16x256xf32>
    %7 = arith.addf %3, %6 : vector<16x256xf32>
    %c0_6 = arith.constant 0 : index
    %c0_7 = arith.constant 0 : index
    %8 = vector.load %arg10[%c0_6, %c0_7] : memref<16x256xf32, #tpu.memory_space<vmem>>, vector<16x256xf32>
    tpu.vector_store %arg10[%c0_6, %c0_7], %7 {strides = array<i32>} : memref<16x256xf32, #tpu.memory_space<vmem>>, vector<16x256xf32>,
    %c2_i32 = arith.constant 2 : i32
    %9 = arith.cmpi eq, %arg1, %c2_i32 : i32
    %10 = arith.extui %9 : i1 to i32
    %c0_i32_8 = arith.constant 0 : i32
    %11 = arith.cmpi ne, %10, %c0_i32_8 : i32
    scf.if %11 {
      %c0_9 = arith.constant 0 : index
      %c0_10 = arith.constant 0 : index
      %12 = vector.load %arg10[%c0_9, %c0_10] : memref<16x256xf32, #tpu.memory_space<vmem>>, vector<16x256xf32>
      %c0_11 = arith.constant 0 : index
      %c0_12 = arith.constant 0 : index
      %13 = vector.load %arg4[%c0_11, %c0_12] : memref<1x256xf32, #tpu.memory_space<vmem>>, vector<1x256xf32>
      %14 = vector.broadcast %13 : vector<1x256xf32> to vector<16x256xf32>
      %15 = arith.addf %12, %14 : vector<16x256xf32>
      %16 = math.tanh %15 : vector<16x256xf32>
      %c0_13 = arith.constant 0 : index
      %c0_14 = arith.constant 0 : index
      %17 = vector.load %arg10[%c0_13, %c0_14] : memref<16x256xf32, #tpu.memory_space<vmem>>, vector<16x256xf32>
      tpu.vector_store %arg10[%c0_13, %c0_14], %16 {strides = array<i32>} : memref<16x256xf32, #tpu.memory_space<vmem>>, vector<16x256xf32>,
      %c0_15 = arith.constant 0 : index
      %c0_16 = arith.constant 0 : index
      %18 = vector.load %arg10[%c0_15, %c0_16] : memref<16x256xf32, #tpu.memory_space<vmem>>, vector<16x256xf32>
      %c0_17 = arith.constant 0 : index
      %c0_18 = arith.constant 0 : index
      %19 = vector.load %arg5[%c0_17, %c0_18] : memref<256x128xf32, #tpu.memory_space<vmem>>, vector<256x128xf32>
      %cst_19 = arith.constant dense<0.000000e+00> : vector<16x128xf32>
      %20 = tpu.matmul %18, %19, %cst_19 {dimension_numbers = #tpu.dot_dimension_numbers<[1], [0], [0], [1], [0, 0, 1, 1], [], []>} : vector<16x256xf32>, vector<256x128xf32>, vector<16x128xf32> -> vector<16x128xf32>
      %c0_20 = arith.constant 0 : index
      %c0_21 = arith.constant 0 : index
      %21 = vector.load %arg6[%c0_20, %c0_21] : memref<1x128xf32, #tpu.memory_space<vmem>>, vector<1x128xf32>
      %22 = vector.broadcast %21 : vector<1x128xf32> to vector<16x128xf32>
      %23 = arith.addf %20, %22 : vector<16x128xf32>
      %24 = math.tanh %23 : vector<16x128xf32>
      %c0_22 = arith.constant 0 : index
      %c0_23 = arith.constant 0 : index
      %25 = vector.load %arg7[%c0_22, %c0_23] : memref<128x384xf32, #tpu.memory_space<vmem>>, vector<128x384xf32>
      %cst_24 = arith.constant dense<0.000000e+00> : vector<16x384xf32>
      %26 = tpu.matmul %24, %25, %cst_24 {dimension_numbers = #tpu.dot_dimension_numbers<[1], [0], [0], [1], [0, 0, 1, 1], [], []>} : vector<16x128xf32>, vector<128x384xf32>, vector<16x384xf32> -> vector<16x384xf32>
      %c0_25 = arith.constant 0 : index
      %c0_26 = arith.constant 0 : index
      %27 = vector.load %arg8[%c0_25, %c0_26] : memref<1x384xf32, #tpu.memory_space<vmem>>, vector<1x384xf32>
      %28 = vector.broadcast %27 : vector<1x384xf32> to vector<16x384xf32>
      %29 = arith.addf %26, %28 : vector<16x384xf32>
      %30 = vector.extract_strided_slice %29 {offsets = [0, 0], sizes = [16, 128], strides = [1, 1]} : vector<16x384xf32> to vector<16x128xf32>
      %31 = vector.shape_cast %30 : vector<16x128xf32> to vector<2x8x128xf32>
      %32 = vector.extract_strided_slice %29 {offsets = [0, 128], sizes = [16, 128], strides = [1, 1]} : vector<16x384xf32> to vector<16x128xf32>
      %33 = vector.shape_cast %32 : vector<16x128xf32> to vector<2x8x128xf32>
      %34 = vector.extract_strided_slice %29 {offsets = [0, 256], sizes = [16, 128], strides = [1, 1]} : vector<16x384xf32> to vector<16x128xf32>
      %35 = vector.shape_cast %34 : vector<16x128xf32> to vector<2x8x128xf32>
      %cst_27 = arith.constant dense<0.000000e+00> : vector<2x8x8xf32>
      %36 = tpu.matmul %31, %33, %cst_27 {dimension_numbers = #tpu.dot_dimension_numbers<[2], [2], [1], [1], [0, 0, 0, 1, 1, 1], [0], [0]>} : vector<2x8x128xf32>, vector<2x8x128xf32>, vector<2x8x8xf32> -> vector<2x8x8xf32>
      %cst_28 = arith.constant 1.250000e-01 : f32
      %37 = vector.broadcast %cst_28 : f32 to vector<2x8x8xf32>
      %38 = arith.mulf %36, %37 : vector<2x8x8xf32>
      %cst_29 = arith.constant dense<0xFF800000> : vector<2x8xf32>
      %39 = vector.multi_reduction <maximumf>, %38, %cst_29 [2] : vector<2x8x8xf32> to vector<2x8xf32>
      %40 = vector.shape_cast %39 : vector<2x8xf32> to vector<2x8x1xf32>
      %41 = vector.broadcast %40 : vector<2x8x1xf32> to vector<2x8x8xf32>
      %42 = arith.subf %38, %41 : vector<2x8x8xf32>
      %43 = math.exp %42 : vector<2x8x8xf32>
      %cst_30 = arith.constant dense<0.000000e+00> : vector<2x8xf32>
      %44 = vector.multi_reduction <add>, %43, %cst_30 [2] : vector<2x8x8xf32> to vector<2x8xf32>
      %45 = vector.shape_cast %44 : vector<2x8xf32> to vector<2x8x1xf32>
      %46 = tpu.reciprocal %45 : vector<2x8x1xf32> -> vector<2x8x1xf32>
      %47 = vector.broadcast %46 : vector<2x8x1xf32> to vector<2x8x8xf32>
      %48 = arith.mulf %43, %47 : vector<2x8x8xf32>
      %cst_31 = arith.constant dense<0.000000e+00> : vector<2x8x128xf32>
      %49 = tpu.matmul %48, %35, %cst_31 {dimension_numbers = #tpu.dot_dimension_numbers<[2], [1], [1], [2], [0, 0, 0, 1, 1, 2], [0], [0]>} : vector<2x8x8xf32>, vector<2x8x128xf32>, vector<2x8x128xf32> -> vector<2x8x128xf32>
      %50 = vector.shape_cast %49 : vector<2x8x128xf32> to vector<16x128xf32>
      %c0_32 = arith.constant 0 : index
      %c0_33 = arith.constant 0 : index
      %51 = vector.load %arg9[%c0_32, %c0_33] : memref<16x128xf32, #tpu.memory_space<vmem>>, vector<16x128xf32>
      tpu.vector_store %arg9[%c0_32, %c0_33], %50 {strides = array<i32>} : memref<16x128xf32, #tpu.memory_space<vmem>>, vector<16x128xf32>,
    } else {
    }
    return
  }
  func.func @transform_0(%arg0: i32, %arg1: i32) -> (i32, i32) {
    %c0_i32 = arith.constant 0 : i32
    return %arg0, %arg1 : i32, i32
  }
  func.func @transform_1(%arg0: i32, %arg1: i32) -> (i32, i32) {
    %c0_i32 = arith.constant 0 : i32
    %c0_i32_0 = arith.constant 0 : i32
    return %arg1, %c0_i32 : i32, i32
  }
  func.func @transform_2(%arg0: i32, %arg1: i32) -> (i32, i32) {
    %c0_i32 = arith.constant 0 : i32
    %c0_i32_0 = arith.constant 0 : i32
    %c0_i32_1 = arith.constant 0 : i32
    return %c0_i32, %c0_i32_0 : i32, i32
  }
  func.func @transform_3(%arg0: i32, %arg1: i32) -> (i32, i32) {
    %c0_i32 = arith.constant 0 : i32
    %c0_i32_0 = arith.constant 0 : i32
    %c0_i32_1 = arith.constant 0 : i32
    return %c0_i32, %c0_i32_0 : i32, i32
  }
  func.func @transform_4(%arg0: i32, %arg1: i32) -> (i32, i32) {
    %c0_i32 = arith.constant 0 : i32
    %c0_i32_0 = arith.constant 0 : i32
    %c0_i32_1 = arith.constant 0 : i32
    return %c0_i32, %c0_i32_0 : i32, i32
  }
  func.func @transform_5(%arg0: i32, %arg1: i32) -> (i32, i32) {
    %c0_i32 = arith.constant 0 : i32
    %c0_i32_0 = arith.constant 0 : i32
    %c0_i32_1 = arith.constant 0 : i32
    return %c0_i32, %c0_i32_0 : i32, i32
  }
  func.func @transform_6(%arg0: i32, %arg1: i32) -> (i32, i32) {
    %c0_i32 = arith.constant 0 : i32
    %c0_i32_0 = arith.constant 0 : i32
    %c0_i32_1 = arith.constant 0 : i32
    return %c0_i32, %c0_i32_0 : i32, i32
  }
  func.func @transform_7(%arg0: i32, %arg1: i32) -> (i32, i32) {
    %c0_i32 = arith.constant 0 : i32
    %c0_i32_0 = arith.constant 0 : i32
    return %arg0, %c0_i32 : i32, i32
  }
}

</mosaic_0001>

<bundles_post_ra>
// kernel: staae_encoder.1
= control target key start
LH: loop header
LB: loop body
LE: loop exit
PB: predicated region body
PF: predicated region fallthrough
CT: control target
= control target key end

     0   :  { %s1729_s24 = smov 0   ;;  %s1731_s25 = smov 0   ;;  %s2150_s0 = inlined_call_operand.vmem [shape: f32[32,384], index: 0, kind: input, shape index: {}]   ;;  %s2151_s1 = inlined_call_operand.vmem [shape: f32[384,256], index: 1, kind: input, shape index: {}]   ;;  %s2152_s2 = inlined_call_operand.vmem [shape: f32[1,256], index: 2, kind: input, shape index: {}]   ;;  %s2153_s3 = inlined_call_operand.vmem [shape: f32[256,128], index: 3, kind: input, shape index: {}]   ;;  %s2154_s4 = inlined_call_operand.vmem [shape: f32[1,128], index: 4, kind: input, shape index: {}]   ;;  %s2155_s5 = inlined_call_operand.vmem [shape: f32[128,384], index: 5, kind: input, shape index: {}]   ;;  %s2156_s6 = inlined_call_operand.vmem [shape: f32[1,384], index: 6, kind: input, shape index: {}]   ;;  %s2157_s7 = inlined_call_operand.vmem [shape: f32[32,128], index: 7, kind: output, shape index: {}]  }
   0x1   :  { %s1733_s26 = smov 0   ;;  %s1735_s27 = smov 0  }
   0x2   :  { %s1737_s28 = smov 0   ;;  %s1739_s29 = smov 0  }
   0x3   :  { %s1741_s30 = smov 0  }
   0x4 LB: > { %s26_s8 = sadd.s32 1, %s1675_s28  ;;  %s29_s9 = sadd.s32 1, %s1679_s29  ;;  %s1683_s30 = sphi %s1741_s30, %s17_s30   ;;  %s1679_s29 = sphi %s1739_s29, %s2163_s29   ;;  %s1675_s28 = sphi %s1737_s28, %s2162_s28   ;;  %s1671_s27 = sphi %s1735_s27, %s2161_s27   ;;  %s1667_s26 = sphi %s1733_s26, %s2160_s26   ;;  %s1663_s25 = sphi %s1731_s25, %s2159_s25   ;;  %s1659_s24 = sphi %s1729_s24, %s2158_s24  }
   0x5   : > { %p27_p0 = scmp.ge.s32.totalorder %s26_s8, 3  ;;  %p45_p1 = scmp.ne.s32.totalorder %s1663_s25, %s1659_s24 }
   0x6   : > { %p46_p2 = scmp.eq.s32.totalorder %s1683_s30, 0  ;;  %s38_s13 = sadd.s32 1, %s1663_s25 }
   0x7   : > { %s2165_s8 = smov (%p27_p0, %s26_s8), 0  ;;  %s2167_s9 = smov (!%p27_p0, %s29_s9), %s1679_s29 }
   0x8   : > { %p47_p3 = por %p46_p2, %p45_p1  ;;  %p31_p4 = scmp.ge.s32.totalorder %s2167_s9, 2 }
   0x9   : > { %s34_s10 = ssub.s32 %s1675_s28, %s2165_s8  ;;  %p1265_p6 = scmp.ge.s32.totalorder %s1683_s30, 6 }
   0xa   : > { %s2169_s9 = smov (%p31_p4, %s2167_s9), 0 }
   0xb   : > { %s33_s11 = ssub.s32 %s1679_s29, %s2169_s9  ;;  %243 = sbr.rel (%p1265_p6) target bundleno = 26 (0x1a), region = 36 }
   0xc   : > { %s35_s12 = sor.u32 %s34_s10, %s33_s11 }
   0xd   : > { %p36_p5 = scmp.eq.s32.totalorder %s35_s12, 0 }
   0xf   : > { %s1780_s14 = scalar_select %p36_p5, %s1663_s25, %s38_s13  }
  0x12   : > { %246 = sbr.rel (!%p47_p3) target bundleno = 26 (0x1a), region = 40  ;;  %s248_s15 = sand.u32 (%p47_p3), 1, %s1663_s25  }
  0x13   : > { %s1548_s16 = smul.u32 (%p47_p3), 6, %s1679_s29  ;;  %s1266_s17 = sshll.u32 (%p47_p3), %s248_s15, 4 }
  0x14   : > { %s250_s23 = scalar_lea.vmem (%p47_p3), [#allocation3], %s1266_s17 }
  0x15   : > { %s253_s18 = sadd.s32 (%p47_p3), %s1675_s28, %s1548_s16 }
  0x16   : > { %s1269_s19 = sshll.u32 (%p47_p3), %s253_s18, 3 }
  0x17   : > { %s255_s22 = scalar_lea.vmem (%p47_p3), %s2150_s0, %s1269_s19 }
  0x18   : > { %v285_v0 = vld [vmem:[%s255_s22] sm:$0xff] (%p47_p3)  ;;  %v287_v1 = vld [vmem:[%s255_s22 + $0x18] sm:$0xff] (%p47_p3) }
  0x19   : > { %286 = vst [vmem:[%s250_s23] sm:$0xff] %v285_v0  ;;  %288 = vst [vmem:[%s250_s23 + $0x8] sm:$0xff] %v287_v1 }
  0x1a PF: > { %p1270_p7 = scmp.ge.s32.totalorder %s1683_s30, 1  ;;  %p303_p8 = scmp.lt.s32.totalorder %s1683_s30, 7 }
  0x1c   : > { %p304_p9 = pnand %p1270_p7, %p303_p8 }
  0x1d   : > { %s310_s10 = sand.u32 (!%p304_p9), 1, %s1659_s24   ;;  %s1272_s11 = sshll.u32 (!%p304_p9), %s1667_s26, 4 }
  0x1e   : > { %307 = sbr.rel (%p304_p9) target bundleno = 1510 (0x5e6), region = 82  ;;  %s1793_s12 = sshll.u32 (!%p304_p9), %s310_s10, 4 }
  0x1f   : > { %p349_p10 = scmp.lt.s32.totalorder (!%p304_p9), %s1272_s11, 47  ;;  %s1275_s13 = sshll.u32 (!%p304_p9), %s1671_s27, 1 }
  0x20   : > { %p356_p11 = scmp.lt.s32.totalorder (!%p304_p9), %s1275_s13, 3  ;;  %s312_s22 = scalar_lea.vmem (!%p304_p9), [#allocation3], %s1793_s12 }
  0x21   : > { %p1277_p12 = scmp.ne.s32.totalorder (!%p304_p9), %s1667_s26, 0 }
  0x25   : > { %s2171_s11 = smov (!%p349_p10, %s1272_s11), 47  ;;  %s2173_s13 = smov (!%p356_p11, %s1275_s13), 3 }
  0x26   : > { %s1284_s15 = sshll.u32 %s2171_s11, 4  ;;  %s1276_s19 = sshll.u32 %s2173_s13, 3  ;;  %v1685_v2 = vmov (!%p1277_p12), 0.0  }
  0x27   : > { %s1799_s18 = scalar_lea.vmem %s2151_s1, %s1284_s15  ;;  %s1804_s24 = scalar_lea.vmem %s2157_s7, %s1276_s19  ;;  %365 = vst [vmem:[#allocation2] sm:$0xff] (!%p1277_p12), %v1685_v2  ;;  %366 = vst [vmem:[#allocation2 + $0x8] sm:$0xff] (!%p1277_p12), %v1685_v2 }
  0x28   : > { %364 = sbr.rel (%p1277_p12) target bundleno = 47 (0x2f), region = 90  ;;  %367 = vst [vmem:[#allocation2 + $0x10] sm:$0xff] (!%p1277_p12), %v1685_v2  ;;  %368 = vst [vmem:[#allocation2 + $0x18] sm:$0xff] (!%p1277_p12), %v1685_v2 }
  0x2f PF: > { %v376_v3 = vld [vmem:[%s1799_s18 + $0x8] sm:$0xff]  ;;  %v378_v4 = vld [vmem:[%s1799_s18 + $0x18] sm:$0xff]  ;;  %v375_v5 = vld [vmem:[%s1799_s18] sm:$0xff]  ;;  %v1686_v10 = vmov 0.0   ;;  %p1278_p13 = scmp.ne.s32.totalorder %s1667_s26, 2 }
  0x30   : > { %v1404_v6 = vpack.c.bf16 %v378_v4, %v376_v3  ;;  %v377_v7 = vld [vmem:[%s1799_s18 + $0x10] sm:$0xff]  ;;  %v380_v8 = vld [vmem:[%s1799_s18 + $0x28] sm:$0xff]  ;;  %v382_v9 = vld [vmem:[%s1799_s18 + $0x38] sm:$0xff]  ;;  %471 = vmatprep.mubr.f32.mxu0 %v1686_v10  ;;  %477 = vmatprep.mubr.f32.mxu1 %v1686_v10  ;;  %vm1688_vm0 = vmmov (!%p1278_p13), 0   ;;  %vm1003_vm1 = vcmask (!%p1278_p13), 64512  }
  0x31   : > { %v1406_v11 = vpack.c.bf16 %v377_v7, %v375_v5  ;;  %v1408_v12 = vpack.c.bf16 %v382_v9, %v380_v8  ;;  %v379_v13 = vld [vmem:[%s1799_s18 + $0x20] sm:$0xff]  ;;  %v381_v14 = vld [vmem:[%s1799_s18 + $0x30] sm:$0xff]  ;;  %v384_v15 = vld [vmem:[%s1799_s18 + $0x48] sm:$0xff]  ;;  %v502_v5 = vlaneseq (!%p1278_p13) }
  0x32   : > { %1405 = vmatprep.subr.bf16.mxu0 %v1404_v6  ;;  %1532 = vmatprep.subr.bf16.mxu1 %v1404_v6  ;;  %v386_v16 = vld [vmem:[%s1799_s18 + $0x58] sm:$0xff]  ;;  %v1410_v17 = vpack.c.bf16 %v381_v14, %v379_v13  ;;  %v383_v19 = vld [vmem:[%s1799_s18 + $0x40] sm:$0xff]  ;;  %v385_v20 = vld [vmem:[%s1799_s18 + $0x50] sm:$0xff] }
  0x33   : > { %1407 = vmatpush1.bf16.msra.mxu0 %v1406_v11  ;;  %1540 = vmatpush1.bf16.msra.mxu1 %v1406_v11  ;;  %v1412_v18 = vpack.c.bf16 %v386_v16, %v384_v15  ;;  %v388_v21 = vld [vmem:[%s1799_s18 + $0x68] sm:$0xff]  ;;  %v390_v22 = vld [vmem:[%s1799_s18 + $0x78] sm:$0xff]  ;;  %v1414_v23 = vpack.c.bf16 %v385_v20, %v383_v19  ;;  %v387_v25 = vld [vmem:[%s1799_s18 + $0x60] sm:$0xff] }
  0x34   : > { %1409 = vmatprep.subr.bf16.mxu0 %v1408_v12  ;;  %1533 = vmatprep.subr.bf16.mxu1 %v1408_v12  ;;  %v1416_v24 = vpack.c.bf16 %v390_v22, %v388_v21  ;;  %v389_v26 = vld [vmem:[%s1799_s18 + $0x70] sm:$0xff]  ;;  %v392_v27 = vld [vmem:[%s1799_s18 + $0x88] sm:$0xff]  ;;  %v394_v28 = vld [vmem:[%s1799_s18 + $0x98] sm:$0xff] }
  0x35   : > { %v1418_v29 = vpack.c.bf16 %v389_v26, %v387_v25  ;;  %v1420_v30 = vpack.c.bf16 %v394_v28, %v392_v27  ;;  %v391_v31 = vld [vmem:[%s1799_s18 + $0x80] sm:$0xff]  ;;  %v393_v32 = vld [vmem:[%s1799_s18 + $0x90] sm:$0xff]  ;;  %v396_v33 = vld [vmem:[%s1799_s18 + $0xa8] sm:$0xff] }
  0x36   : > { %v398_v34 = vld [vmem:[%s1799_s18 + $0xb8] sm:$0xff]  ;;  %v1422_v35 = vpack.c.bf16 %v393_v32, %v391_v31  ;;  %v395_v37 = vld [vmem:[%s1799_s18 + $0xa0] sm:$0xff]  ;;  %v397_v38 = vld [vmem:[%s1799_s18 + $0xb0] sm:$0xff] }
  0x37   : > { %1411 = vmatpush1.bf16.msra.mxu0 %v1410_v17  ;;  %1541 = vmatpush1.bf16.msra.mxu1 %v1410_v17  ;;  %v1424_v36 = vpack.c.bf16 %v398_v34, %v396_v33  ;;  %v400_v39 = vld [vmem:[%s1799_s18 + $0xc8] sm:$0xff]  ;;  %v402_v40 = vld [vmem:[%s1799_s18 + $0xd8] sm:$0xff]  ;;  %v1426_v41 = vpack.c.bf16 %v397_v38, %v395_v37  ;;  %v399_v43 = vld [vmem:[%s1799_s18 + $0xc0] sm:$0xff]  ;;  %v1875_v17 = vshrl.u32 (!%p1278_p13), %v502_v5, 7 }
  0x38   : > { %1413 = vmatprep.subr.bf16.mxu0 %v1412_v18  ;;  %1534 = vmatprep.subr.bf16.mxu1 %v1412_v18  ;;  %v1428_v42 = vpack.c.bf16 %v402_v40, %v400_v39  ;;  %v401_v44 = vld [vmem:[%s1799_s18 + $0xd0] sm:$0xff]  ;;  %v404_v45 = vld [vmem:[%s1799_s18 + $0xe8] sm:$0xff]  ;;  %v406_v46 = vld [vmem:[%s1799_s18 + $0xf8] sm:$0xff] }
  0x39   : > { %v1430_v47 = vpack.c.bf16 %v401_v44, %v399_v43  ;;  %v1432_v48 = vpack.c.bf16 %v406_v46, %v404_v45  ;;  %v403_v49 = vld [vmem:[%s1799_s18 + $0xe0] sm:$0xff]  ;;  %v405_v50 = vld [vmem:[%s1799_s18 + $0xf0] sm:$0xff]  ;;  %v374_v53 = vld [vmem:[%s312_s22 + $0x8] sm:$0xff]  ;;  %v504_v25 = vsub.s32 (!%p1278_p13), 0, %v1875_v17 }
  0x3a   : > { %v1434_v51 = vpack.c.bf16 %v405_v50, %v403_v49  ;;  %v373_v52 = vld [vmem:[%s312_s22] sm:$0xff]  ;;  %v370_v56 = vld [vmem:[#allocation2 + $0x8] sm:$0xff]  ;;  %v372_v57 = vld [vmem:[#allocation2 + $0x18] sm:$0xff] }
  0x3b   : > { %1415 = vmatpush1.bf16.msra.mxu0 %v1414_v23  ;;  %1542 = vmatpush1.bf16.msra.mxu1 %v1414_v23  ;;  %v369_v54 = vld [vmem:[#allocation2] sm:$0xff]  ;;  %v371_v55 = vld [vmem:[#allocation2 + $0x10] sm:$0xff]  ;;  %v545_v3 = vld [vmem:[%s2153_s3 + $0x88] sm:$0xff] (!%p1278_p13) }
  0x3c   : > { %1417 = vmatprep.subr.bf16.mxu0 %v1416_v24  ;;  %1535 = vmatprep.subr.bf16.mxu1 %v1416_v24  ;;  %v544_v2 = vld [vmem:[%s2153_s3 + $0x80] sm:$0xff] (!%p1278_p13)  ;;  %v529_v7 = vld [vmem:[%s2153_s3 + $0x8] sm:$0xff] (!%p1278_p13)  ;;  %v546_v8 = vld [vmem:[%s2153_s3 + $0x90] sm:$0xff] (!%p1278_p13)  ;;  %v508_v24 = vsub.s32 (!%p1278_p13), 1, %v1875_v17 }
  0x3d   : > { %v528_v4 = vld [vmem:[%s2153_s3] sm:$0xff] (!%p1278_p13)  ;;  %v1436_v6 = vpack.c.bf16 (!%p1278_p13), %v545_v3, %v544_v2  ;;  %v547_v9 = vld [vmem:[%s2153_s3 + $0x98] sm:$0xff] (!%p1278_p13)  ;;  %v530_v12 = vld [vmem:[%s2153_s3 + $0x10] sm:$0xff] (!%p1278_p13) }
  0x3e   : > { %v1438_v10 = vpack.c.bf16 (!%p1278_p13), %v529_v7, %v528_v4  ;;  %v1440_v11 = vpack.c.bf16 (!%p1278_p13), %v547_v9, %v546_v8  ;;  %v531_v13 = vld [vmem:[%s2153_s3 + $0x18] sm:$0xff] (!%p1278_p13)  ;;  %v548_v14 = vld [vmem:[%s2153_s3 + $0xa0] sm:$0xff] (!%p1278_p13)  ;;  %v549_v15 = vld [vmem:[%s2153_s3 + $0xa8] sm:$0xff] (!%p1278_p13) }
  0x3f   : > { %1419 = vmatpush1.bf16.msra.mxu0 %v1418_v29  ;;  %1543 = vmatpush1.bf16.msra.mxu1 %v1418_v29  ;;  %v1442_v16 = vpack.c.bf16 (!%p1278_p13), %v531_v13, %v530_v12  ;;  %v1444_v18 = vpack.c.bf16 (!%p1278_p13), %v549_v15, %v548_v14  ;;  %v532_v19 = vld [vmem:[%s2153_s3 + $0x20] sm:$0xff] (!%p1278_p13)  ;;  %v533_v20 = vld [vmem:[%s2153_s3 + $0x28] sm:$0xff] (!%p1278_p13)  ;;  %v550_v21 = vld [vmem:[%s2153_s3 + $0xb0] sm:$0xff] (!%p1278_p13) }
  0x40   : > { %1421 = vmatprep.subr.bf16.mxu0 %v1420_v30  ;;  %1536 = vmatprep.subr.bf16.mxu1 %v1420_v30  ;;  %v551_v22 = vld [vmem:[%s2153_s3 + $0xb8] sm:$0xff] (!%p1278_p13)  ;;  %v1446_v23 = vpack.c.bf16 (!%p1278_p13), %v533_v20, %v532_v19  ;;  %v534_v27 = vld [vmem:[%s2153_s3 + $0x30] sm:$0xff] (!%p1278_p13)  ;;  %v552_v29 = vld [vmem:[%s2153_s3 + $0xc0] sm:$0xff] (!%p1278_p13) }
  0x41   : > { %v1448_v26 = vpack.c.bf16 (!%p1278_p13), %v551_v22, %v550_v21  ;;  %v535_v28 = vld [vmem:[%s2153_s3 + $0x38] sm:$0xff] (!%p1278_p13)  ;;  %v553_v30 = vld [vmem:[%s2153_s3 + $0xc8] sm:$0xff] (!%p1278_p13)  ;;  %v536_v32 = vld [vmem:[%s2153_s3 + $0x40] sm:$0xff] (!%p1278_p13) }
  0x42   : > { %v537_v33 = vld [vmem:[%s2153_s3 + $0x48] sm:$0xff] (!%p1278_p13)  ;;  %v500_v34 = vld [vmem:[%s2152_s2] sm:$0x3] (!%p1278_p13)  ;;  %v1450_v37 = vpack.c.bf16 (!%p1278_p13), %v535_v28, %v534_v27  ;;  %v554_v38 = vld [vmem:[%s2153_s3 + $0xd0] sm:$0xff] (!%p1278_p13)  ;;  %v1452_v45 = vpack.c.bf16 (!%p1278_p13), %v553_v30, %v552_v29 }
  0x43   : > { %1423 = vmatpush1.bf16.msra.mxu0 %v1422_v35  ;;  %1544 = vmatpush1.bf16.msra.mxu1 %v1422_v35  ;;  %v555_v39 = vld [vmem:[%s2153_s3 + $0xd8] sm:$0xff] (!%p1278_p13)  ;;  %v509_v40 = vrot.slane (!%p1278_p13), %v500_v34, %v508_v24  ;;  %v645_v43 = vld [vmem:[%s2155_s5 + $0x8] sm:$0xff] (!%p1278_p13)  ;;  %v648_v44 = vld [vmem:[%s2155_s5 + $0x20] sm:$0xff] (!%p1278_p13) }
  0x44   : > { %1425 = vmatprep.subr.bf16.mxu0 %v1424_v36  ;;  %1537 = vmatprep.subr.bf16.mxu1 %v1424_v36  ;;  %v1468_v46 = vpack.c.bf16 (!%p1278_p13), %v648_v44, %v645_v43  ;;  %v651_v49 = vld [vmem:[%s2155_s5 + $0x38] sm:$0xff] (!%p1278_p13)  ;;  %v557_v3 = vld [vmem:[%s2153_s3 + $0xe8] sm:$0xff] (!%p1278_p13)  ;;  %v656_v5 = vld [vmem:[%s2155_s5 + $0x60] sm:$0xff] (!%p1278_p13) }
  0x45   : > { %v663_v7 = vld [vmem:[%s2155_s5 + $0x98] sm:$0xff] (!%p1278_p13)  ;;  %v666_v8 = vld [vmem:[%s2155_s5 + $0xb0] sm:$0xff] (!%p1278_p13)  ;;  %v541_v12 = vld [vmem:[%s2153_s3 + $0x68] sm:$0xff] (!%p1278_p13) }
  0x46   : > { %v558_v13 = vld [vmem:[%s2153_s3 + $0xf0] sm:$0xff] (!%p1278_p13)  ;;  %v559_v15 = vld [vmem:[%s2153_s3 + $0xf8] sm:$0xff] (!%p1278_p13)  ;;  %v665_v19 = vld [vmem:[%s2155_s5 + $0xa8] sm:$0xff] (!%p1278_p13) }
  0x47   : > { %1427 = vmatpush1.bf16.msra.mxu0 %v1426_v41  ;;  %1545 = vmatpush1.bf16.msra.mxu1 %v1426_v41  ;;  %v505_v41 = vrot.slane (!%p1278_p13), %v500_v34, %v504_v25  ;;  %v1464_v21 = vpack.c.bf16 (!%p1278_p13), %v559_v15, %v558_v13  ;;  %v542_v22 = vld [vmem:[%s2153_s3 + $0x70] sm:$0xff] (!%p1278_p13)  ;;  %v649_v29 = vld [vmem:[%s2155_s5 + $0x28] sm:$0xff] (!%p1278_p13)  ;;  %v664_v43 = vld [vmem:[%s2155_s5 + $0xa0] sm:$0xff] (!%p1278_p13) }
  0x48   : > { %1429 = vmatprep.subr.bf16.mxu0 %v1428_v42  ;;  %1538 = vmatprep.subr.bf16.mxu1 %v1428_v42  ;;  %v646_v28 = vld [vmem:[%s2155_s5 + $0x10] sm:$0xff] (!%p1278_p13)  ;;  %v691_v15 = vld [vmem:[%s2155_s5 + $0x178] sm:$0xff] (!%p1278_p13) }
  0x49   : > { %v1500_v34 = vpack.c.bf16 (!%p1278_p13), %v649_v29, %v646_v28 }
  0x4b   : > { %1431 = vmatpush1.bf16.msra.mxu0 %v1430_v47  ;;  %1546 = vmatpush1.bf16.msra.mxu1 %v1430_v47  ;;  %v644_v47 = vld [vmem:[%s2155_s5] sm:$0xff] (!%p1278_p13) }
  0x4c   : > { %1433 = vmatprep.subr.bf16.mxu0 %v1432_v48  ;;  %1539 = vmatprep.subr.bf16.mxu1 %v1432_v48  ;;  %v647_v48 = vld [vmem:[%s2155_s5 + $0x18] sm:$0xff] (!%p1278_p13) }
  0x4f   : > { %1435 = vmatpush1.bf16.msra.mxu0 %v1434_v51  ;;  %1547 = vmatpush1.bf16.msra.mxu1 %v1434_v51 }
  0x50   : > { %1437 = vmatprep.subr.bf16.mxu0 (!%p1278_p13), %v1436_v6  ;;  %1469 = vmatprep.subr.bf16.mxu1 (!%p1278_p13), %v1468_v46  ;;  %v659_v6 = vld [vmem:[%s2155_s5 + $0x78] sm:$0xff] (!%p1278_p13) }
  0x51   : > { %v1478_v14 = vpack.c.bf16 (!%p1278_p13), %v659_v6, %v656_v5  ;;  %v671_v46 = vld [vmem:[%s2155_s5 + $0xd8] sm:$0xff] (!%p1278_p13)  ;;  %v690_v5 = vld [vmem:[%s2155_s5 + $0x170] sm:$0xff] (!%p1278_p13) }
  0x52   : > { %472 = vmatmul.mubr.f32.vlgmr.msra.gmra.mrb[0].mxu0 %v373_v52  ;;  %478 = vmatmul.mubr.f32.vlgmr.msra.gmra.mrb[0].mxu1 %v374_v53  ;;  %v654_v53 = vld [vmem:[%s2155_s5 + $0x50] sm:$0xff] (!%p1278_p13) }
  0x53   : > { %1439 = vmatpush3.bf16.msra.mxu0 (!%p1278_p13), %v1438_v10  ;;  %v686_v6 = vld [vmem:[%s2155_s5 + $0x150] sm:$0xff] (!%p1278_p13) }
  0x54   : > { %1441 = vmatprep.subr.bf16.mxu0 (!%p1278_p13), %v1440_v11  ;;  %v540_v11 = vld [vmem:[%s2153_s3 + $0x60] sm:$0xff] (!%p1278_p13) }
  0x55   : > { %v1462_v20 = vpack.c.bf16 (!%p1278_p13), %v541_v12, %v540_v11  ;;  %v1687_v11 = vmov (!%p1278_p13), 0.0  }
  0x56   : > { %773 = vmatprep.mubr.f32.mxu1 (!%p1278_p13), %v1687_v11 }
  0x57   : > { %1443 = vmatpush3.bf16.msra.mxu0 (!%p1278_p13), %v1442_v16  ;;  %v1480_v16 = vpack.c.bf16 (!%p1278_p13), %v666_v8, %v663_v7  ;;  %v689_v8 = vld [vmem:[%s2155_s5 + $0x168] sm:$0xff] (!%p1278_p13) }
  0x58   : > { %1445 = vmatprep.subr.bf16.mxu0 (!%p1278_p13), %v1444_v18  ;;  %v662_v18 = vld [vmem:[%s2155_s5 + $0x90] sm:$0xff] (!%p1278_p13)  ;;  %v1498_v12 = vpack.c.bf16 (!%p1278_p13), %v689_v8, %v686_v6 }
  0x5b   : > { %1447 = vmatpush3.bf16.msra.mxu0 (!%p1278_p13), %v1446_v23  ;;  %v543_v23 = vld [vmem:[%s2153_s3 + $0x78] sm:$0xff] (!%p1278_p13) }
  0x5c   : > { %1449 = vmatprep.subr.bf16.mxu0 (!%p1278_p13), %v1448_v26  ;;  %v1482_v26 = vpack.c.bf16 (!%p1278_p13), %v665_v19, %v662_v18  ;;  %v1279_v19 = vld [vmem:[%s2154_s4] ss:$0 sm:$0xff] (!%p1278_p13) }
  0x5f   : > { %1451 = vmatpush3.bf16.msra.mxu0 (!%p1278_p13), %v1450_v37 }
  0x60   : > { %1453 = vmatprep.subr.bf16.mxu0 (!%p1278_p13), %v1452_v45  ;;  %v668_v45 = vld [vmem:[%s2155_s5 + $0xc0] sm:$0xff] (!%p1278_p13) }
 0x123   : > { %495 = sbr.rel (%p1278_p13) target bundleno = 1510 (0x5e6), region = 94 }
 0x125   : > { %v473_v58 = vpop.f32.mrb[0].mxu0  ;;  %v479_v59 = vpop.f32.mrb[0].mxu1 }
 0x126   : > { %v484_v60 = vadd.f32 %v473_v58, %v369_v54  ;;  %v486_v61 = vadd.f32 %v479_v59, %v371_v55  ;;  %v475_v62 = vpop.f32.mrb[1].mxu0  ;;  %v481_v63 = vpop.f32.mrb[1].mxu1  ;;  %v650_v54 = vld [vmem:[%s2155_s5 + $0x30] sm:$0xff] (!%p1278_p13)  ;;  %v653_v55 = vld [vmem:[%s2155_s5 + $0x48] sm:$0xff] (!%p1278_p13)  ;;  %v1472_v58 = vpack.c.bf16 (!%p1278_p13), %v654_v53, %v651_v49 }
 0x127   : > { %v485_v0 = vadd.f32 %v475_v62, %v370_v56  ;;  %v487_v1 = vadd.f32 %v481_v63, %v372_v57  ;;  %v1470_v57 = vpack.c.bf16 (!%p1278_p13), %v647_v48, %v644_v47  ;;  %v657_v59 = vld [vmem:[%s2155_s5 + $0x68] sm:$0xff] (!%p1278_p13)  ;;  %v1456_v62 = vpack.c.bf16 (!%p1278_p13), %v555_v39, %v554_v38  ;;  %v538_v63 = vld [vmem:[%s2153_s3 + $0x50] sm:$0xff] (!%p1278_p13)  ;;  %v667_v47 = vld [vmem:[%s2155_s5 + $0xb8] sm:$0xff] (!%p1278_p13) }
 0x128   : > { %488 = vst [vmem:[#allocation2] sm:$0xff] %v484_v60  ;;  %490 = vst [vmem:[#allocation2 + $0x10] sm:$0xff] %v486_v61  ;;  %v1454_v60 = vpack.c.bf16 (!%p1278_p13), %v537_v33, %v536_v32  ;;  %v660_v61 = vld [vmem:[%s2155_s5 + $0x80] sm:$0xff] (!%p1278_p13)  ;;  %v1474_v2 = vpack.c.bf16 (!%p1278_p13), %v653_v55, %v650_v54  ;;  %v1466_v32 = vpack.c.bf16 (!%p1278_p13), %v543_v23, %v542_v22  ;;  %v658_v38 = vld [vmem:[%s2155_s5 + $0x70] sm:$0xff] (!%p1278_p13) }
 0x129   : > { %489 = vst [vmem:[#allocation2 + $0x8] sm:$0xff] %v485_v0  ;;  %491 = vst [vmem:[#allocation2 + $0x18] sm:$0xff] %v487_v1  ;;  %v539_v0 = vld [vmem:[%s2153_s3 + $0x58] sm:$0xff] (!%p1278_p13)  ;;  %v556_v1 = vld [vmem:[%s2153_s3 + $0xe0] sm:$0xff] (!%p1278_p13)  ;;  %1471 = vmatpush1.bf16.msra.mxu1 (!%p1278_p13), %v1470_v57  ;;  %v1476_v4 = vpack.c.bf16 (!%p1278_p13), %v660_v61, %v657_v59  ;;  %v1486_v48 = vpack.c.bf16 (!%p1278_p13), %v671_v46, %v668_v45  ;;  %v1512_v49 = vpack.c.bf16 (!%p1278_p13), %v667_v47, %v664_v43 }
 0x12a   : > { %1473 = vmatprep.subr.bf16.mxu1 %v1472_v58  ;;  %1455 = vmatpush3.bf16.msra.mxu0 %v1454_v60  ;;  %v1458_v9 = vpack.c.bf16 %v539_v0, %v538_v63  ;;  %v1460_v10 = vpack.c.bf16 %v557_v3, %v556_v1  ;;  %v661_v39 = vld [vmem:[%s2155_s5 + $0x88] sm:$0xff]  ;;  %v674_v54 = vld [vmem:[%s2155_s5 + $0xf0] sm:$0xff]  ;;  %v684_v60 = vld [vmem:[%s2155_s5 + $0x140] sm:$0xff] }
 0x12b   : > { %1457 = vmatprep.subr.bf16.mxu0 %v1456_v62  ;;  %v677_v55 = vld [vmem:[%s2155_s5 + $0x108] sm:$0xff]  ;;  %v676_v61 = vld [vmem:[%s2155_s5 + $0x100] sm:$0xff]  ;;  %v683_v0 = vld [vmem:[%s2155_s5 + $0x138] sm:$0xff] }
 0x12c   : > { %v1490_v57 = vpack.c.bf16 %v677_v55, %v674_v54  ;;  %v681_v59 = vld [vmem:[%s2155_s5 + $0x128] sm:$0xff]  ;;  %v680_v63 = vld [vmem:[%s2155_s5 + $0x120] sm:$0xff]  ;;  %v679_v1 = vld [vmem:[%s2155_s5 + $0x118] sm:$0xff] }
 0x12d   : > { %1475 = vmatpush1.bf16.msra.mxu1 %v1474_v2  ;;  %v1492_v62 = vpack.c.bf16 %v684_v60, %v681_v59  ;;  %v1494_v2 = vpack.c.bf16 %v683_v0, %v680_v63  ;;  %v1520_v3 = vpack.c.bf16 %v679_v1, %v676_v61 }
 0x12e   : > { %1477 = vmatprep.subr.bf16.mxu1 %v1476_v4  ;;  %1459 = vmatpush3.bf16.msra.mxu0 %v1458_v9  ;;  %v687_v4 = vld [vmem:[%s2155_s5 + $0x158] sm:$0xff]  ;;  %v682_v9 = vld [vmem:[%s2155_s5 + $0x130] sm:$0xff] }
 0x12f   : > { %v496_v35 = vld [vmem:[#allocation2] sm:$0xff]  ;;  %v498_v42 = vld [vmem:[#allocation2 + $0x10] sm:$0xff]  ;;  %1461 = vmatprep.subr.bf16.mxu0 %v1460_v10  ;;  %v1496_v7 = vpack.c.bf16 %v690_v5, %v687_v4  ;;  %v685_v10 = vld [vmem:[%s2155_s5 + $0x148] sm:$0xff] }
 0x130   : > { %v497_v31 = vld [vmem:[#allocation2 + $0x8] sm:$0xff]  ;;  %v499_v36 = vld [vmem:[#allocation2 + $0x18] sm:$0xff]  ;;  %v512_v51 = vadd.f32 %v505_v41, %v496_v35  ;;  %v514_v56 = vadd.f32 %v505_v41, %v498_v42  ;;  %v652_v35 = vld [vmem:[%s2155_s5 + $0x40] sm:$0xff]  ;;  %v1524_v13 = vpack.c.bf16 %v685_v10, %v682_v9 }
 0x131   : > { %v513_v50 = vadd.f32 %v509_v40, %v497_v31  ;;  %v515_v52 = vadd.f32 %v509_v40, %v499_v36  ;;  %1479 = vmatpush1.bf16.msra.mxu1 %v1478_v14  ;;  %v655_v36 = vld [vmem:[%s2155_s5 + $0x58] sm:$0xff]  ;;  %v1508_v40 = vpack.c.bf16 %v661_v39, %v658_v38  ;;  %v669_v41 = vld [vmem:[%s2155_s5 + $0xc8] sm:$0xff]  ;;  %v672_v42 = vld [vmem:[%s2155_s5 + $0xe0] sm:$0xff] }
 0x132   : > { %1481 = vmatprep.subr.bf16.mxu1 %v1480_v16  ;;  %1463 = vmatpush3.bf16.msra.mxu0 %v1462_v20  ;;  %v1504_v37 = vpack.c.bf16 %v655_v36, %v652_v35  ;;  %v1484_v44 = vpack.c.bf16 %v672_v42, %v669_v41  ;;  %v688_v14 = vld [vmem:[%s2155_s5 + $0x160] sm:$0xff] }
 0x133   : > { %1609 = vtanh.f32 %v513_v50  ;;  %1465 = vmatprep.subr.bf16.mxu0 %v1464_v21  ;;  %v675_v50 = vld [vmem:[%s2155_s5 + $0xf8] sm:$0xff]  ;;  %v1528_v16 = vpack.c.bf16 %v691_v15, %v688_v14 }
 0x134   : > { %1611 = vtanh.f32 %v512_v51  ;;  %v678_v51 = vld [vmem:[%s2155_s5 + $0x110] sm:$0xff] }
 0x135   : > { %1613 = vtanh.f32 %v515_v52  ;;  %1483 = vmatpush1.bf16.msra.mxu1 %v1482_v26  ;;  %v670_v52 = vld [vmem:[%s2155_s5 + $0xd0] sm:$0xff]  ;;  %v1488_v53 = vpack.c.bf16 %v678_v51, %v675_v50 }
 0x136   : > { %1615 = vtanh.f32 %v514_v56  ;;  %1467 = vmatpush3.bf16.msra.mxu0 %v1466_v32  ;;  %1485 = vmatprep.subr.bf16.mxu1 %v1484_v44  ;;  %v673_v56 = vld [vmem:[%s2155_s5 + $0xe8] sm:$0xff]  ;;  %v704_v32 = vsub.s32 2, %v1875_v17 }
 0x137   : > { %1501 = vmatprep.subr.bf16.mxu0 %v1500_v34  ;;  %v1516_v58 = vpack.c.bf16 %v673_v56, %v670_v52 }
 0x139   : > { %1487 = vmatpush1.bf16.msra.mxu1 %v1486_v48 }
 0x13a   : > { %1489 = vmatprep.subr.bf16.mxu1 %v1488_v53 }
 0x13d   : > { %v1610_v27 = vpop.eup %1609  ;;  %1491 = vmatpush1.bf16.msra.mxu1 %v1490_v57 }
 0x13e   : > { %v1612_v30 = vpop.eup %1611  ;;  %521 = vst [vmem:[#allocation2 + $0x8] sm:$0xff] %v1610_v27  ;;  %631 = vmatprep.mubr.f32.mxu0 %v1610_v27  ;;  %1493 = vmatprep.subr.bf16.mxu1 %v1492_v62 }
 0x13f   : > { %v1614_v31 = vpop.eup %1613  ;;  %520 = vst [vmem:[#allocation2] sm:$0xff] %v1612_v30  ;;  %632 = vmatmul.mubr.f32.vlgmr.msra.gmra.mrb[0].mxu0 %v1612_v30 }
 0x140   : > { %v1616_v33 = vpop.eup %1615  ;;  %523 = vst [vmem:[#allocation2 + $0x18] sm:$0xff] %v1614_v31  ;;  %636 = vmatprep.mubr.f32.mxu0 %v1614_v31  ;;  %1503 = vmatpush3.bf16.msra.mxu0 %v1500_v34  ;;  %v692_v31 = vld [vmem:[%s2156_s6] sm:$0x7] }
 0x141   : > { %522 = vst [vmem:[#allocation2 + $0x10] sm:$0xff] %v1616_v33  ;;  %1505 = vmatprep.subr.bf16.mxu0 %v1504_v37  ;;  %1495 = vmatpush1.bf16.msra.mxu1 %v1494_v2  ;;  %v697_v35 = vrot.slane %v692_v31, %v504_v25 }
 0x142   : > { %1497 = vmatprep.subr.bf16.mxu1 %v1496_v7 }
 0x143   : > { %637 = vmatmul.mubr.f32.gmra.mrb[2].mxu0 %v1616_v33  ;;  %v701_v33 = vrot.slane %v692_v31, %v508_v24 }
 0x144   : > { %1507 = vmatpush3.bf16.msra.mxu0 %v1504_v37  ;;  %v705_v37 = vrot.slane %v692_v31, %v704_v32 }
 0x145   : > { %1509 = vmatprep.subr.bf16.mxu0 %v1508_v40  ;;  %1499 = vmatpush1.bf16.msra.mxu1 %v1498_v12 }
 0x146   : > { %1384 = vmatprep.subr.mxu1 %v1687_v11 }
 0x148   : > { %1511 = vmatpush3.bf16.msra.mxu0 %v1508_v40 }
 0x149   : > { %1513 = vmatprep.subr.bf16.mxu0 %v1512_v49 }
 0x14c   : > { %1515 = vmatpush3.bf16.msra.mxu0 %v1512_v49 }
 0x14d   : > { %1517 = vmatprep.subr.bf16.mxu0 %v1516_v58 }
 0x150   : > { %1519 = vmatpush3.bf16.msra.mxu0 %v1516_v58 }
 0x151   : > { %1521 = vmatprep.subr.bf16.mxu0 %v1520_v3 }
 0x154   : > { %1523 = vmatpush3.bf16.msra.mxu0 %v1520_v3 }
 0x155   : > { %1525 = vmatprep.subr.bf16.mxu0 %v1524_v13 }
 0x158   : > { %1527 = vmatpush3.bf16.msra.mxu0 %v1524_v13 }
 0x159   : > { %1529 = vmatprep.subr.bf16.mxu0 %v1528_v16 }
 0x15c   : > { %1531 = vmatpush3.bf16.msra.mxu0 %v1528_v16 }
 0x212   : > { %v1317_v18 = vpop.f32.mrb[0].mxu0 }
 0x213   : > { %v1318_v20 = vpop.f32.mrb[1].mxu0 }
 0x214   : > { %v1319_v21 = vadd.f32 %v1318_v20, %v1317_v18 }
 0x216   : > { %v634_v22 = vadd.f32 %v1319_v21, %v1279_v19  ;;  %v1320_v23 = vpop.f32.mrb[2].mxu0 }
 0x217   : > { %v1321_v26 = vpop.f32.mrb[3].mxu0 }
 0x218   : > { %1617 = vtanh.f32 %v634_v22  ;;  %v1322_v27 = vadd.f32 %v1321_v26, %v1320_v23 }
 0x21a   : > { %v639_v28 = vadd.f32 %v1322_v27, %v1279_v19 }
 0x21c   : > { %1619 = vtanh.f32 %v639_v28 }
 0x222   : > { %v1618_v29 = vpop.eup %1617 }
 0x223   : > { %774 = vmatmul.mubr.f32.vlgmr.msra.gmra.mrb[0].mxu1 %v1618_v29  ;;  %1381 = vmatprep.mubr.f32.mxu0 %v1618_v29 }
 0x224   : > { %779 = vmatprep.mubr.f32.mxu1 %v1687_v11 }
 0x226   : > { %v1620_v30 = vpop.eup %1619 }
 0x227   : > { %780 = vmatmul.mubr.f32.gmra.mrb[2].mxu1 %v1620_v30  ;;  %1382 = vmatmul.mubr.f32.vlgmr.msra.gmra.mrb[4].mxu0 %v1620_v30 }
 0x228   : > { %1386 = vmatprep.mubr.msk.f32.mxu1 %vm1688_vm0, %v1687_v11 }
 0x2f6   : > { %v775_v34 = vpop.f32.mrb[0].mxu1 }
 0x2f7   : > { %v777_v36 = vpop.f32.mrb[1].mxu1  ;;  %v776_v41 = vadd.f32 %v775_v34, %v697_v35 }
 0x2f8   : > { %v778_v38 = vadd.f32 %v777_v36, %v701_v33 }
 0x2fa   : > { %v781_v39 = vpop.f32.mrb[2].mxu1  ;;  %1385 = vmatpush3.xpose.msra.mxu1 %v778_v38  ;;  %v1383_v40 = vpop.f32.mrb[4].mxu0 }
 0x2fb   : > { %v783_v42 = vpop.f32.mrb[3].mxu1  ;;  %v858_v43 = vadd.f32 %v1383_v40, %v705_v37  ;;  %v852_v44 = vpop.f32.mrb[5].mxu0  ;;  %1389 = vmatprep.subr.mxu1 %v1687_v11  ;;  %v782_v17 = vadd.f32 %v781_v39, %v697_v35 }
 0x2fc   : > { %v784_v45 = vadd.f32 %v783_v42, %v701_v33  ;;  %v853_v24 = vadd.f32 %v852_v44, %v705_v37 }
 0x2fd   : > { %1387 = vmatmul.mubr.f32.vlgmr.msra.gmra.mrb[4].mxu1 %v776_v41 }
 0x2fe   : > { %1390 = vmatpush3.xpose.msra.mxu1 %v784_v45  ;;  %1391 = vmatprep.mubr.msk.f32.mxu1 %vm1688_vm0, %v1687_v11 }
 0x2ff   : > { %1394 = vmatprep.subr.mxu1 %v1687_v11 }
 0x301   : > { %1392 = vmatmul.mubr.f32.vlgmr.msra.gmra.mrb[6].mxu1 %v782_v17 }
 0x302   : > { %1395 = vmatpush3.msra.mxu1 %v853_v24  ;;  %1396 = vmatprep.mubr.msk.f32.mxu1 %vm1688_vm0, %v1687_v11 }
 0x303   : > { %1399 = vmatprep.subr.mxu1 %v1687_v11 }
 0x3d0   : > { %v927_v25 = vpop.f32.mrb[4].mxu1 }
 0x3d1   : > { %v1001_v46 = vmul.f32 0.125, %v927_v25  ;;  %v1388_v47 = vpop.f32.mrb[5].mxu1 }
 0x3d3   : > { %v1004_v48 = vsel %vm1003_vm1, %v1001_v46, -inf }
 0x3d4   : > { %1005 = vmax.xlane.f32.xlu0 %v1004_v48  ;;  %v997_v49 = vpop.f32.mrb[6].mxu1 }
 0x3d5   : > { %v1002_v50 = vmul.f32 0.125, %v997_v49  ;;  %v1393_v51 = vpop.f32.mrb[7].mxu1 }
 0x3d7   : > { %v1007_v52 = vsel %vm1003_vm1, %v1002_v50, -inf }
 0x3d8   : > { %1008 = vmax.xlane.f32.xlu0 %v1007_v52 }
 0x461   : > { %v1006_v53 = vpop.xlane.xlu0 %1005 }
 0x462   : > { %v1010_v54 = vsub.f32 %v1001_v46, %v1006_v53 }
 0x464   : > { %v1012_v55 = vmul.f32 1.442695, %v1010_v54 }
 0x465   : > { %v1009_v56 = vpop.xlane.xlu0 %1008 }
 0x466   : > { %1621 = vpow2.f32 %v1012_v55  ;;  %v1011_v57 = vsub.f32 %v1002_v50, %v1009_v56 }
 0x468   : > { %v1014_v58 = vmul.f32 1.442695, %v1011_v57 }
 0x46a   : > { %1623 = vpow2.f32 %v1014_v58 }
 0x470   : > { %v1622_v59 = vpop.eup %1621 }
 0x471   : > { %v1016_v60 = vsel %vm1003_vm1, %v1622_v59, 0.0 }
 0x472   : > { %1017 = vadd.xlane.f32.xlu1 %v1016_v60 }
 0x474   : > { %v1624_v61 = vpop.eup %1623 }
 0x475   : > { %v1019_v62 = vsel %vm1003_vm1, %v1624_v61, 0.0 }
 0x476   : > { %1020 = vadd.xlane.f32.xlu1 %v1019_v62 }
 0x4ff   : > { %v1018_v63 = vpop.xlane.xlu1 %1017 }
 0x500   : > { %1625 = vrcp.f32 %v1018_v63 }
 0x503   : > { %v1021_v0 = vpop.xlane.xlu1 %1020 }
 0x504   : > { %1627 = vrcp.f32 %v1021_v0 }
 0x50a   : > { %v1626_v1 = vpop.eup %1625 }
 0x50b   : > { %v1024_v2 = vmul.f32 %v1626_v1, %v1622_v59 }
 0x50d   : > { %1397 = vmatmul.mubr.msk.f32.vlgmr.msra.gmra.mrb[8].mxu1 %vm1003_vm1, %v1024_v2 }
 0x50e   : > { %v1628_v3 = vpop.eup %1627  ;;  %1400 = vmatpush3.msra.mxu1 %v858_v43  ;;  %1401 = vmatprep.mubr.msk.f32.mxu1 %vm1688_vm0, %v1687_v11 }
 0x50f   : > { %v1025_v4 = vmul.f32 %v1628_v3, %v1624_v61 }
 0x511   : > { %1402 = vmatmul.mubr.msk.f32.vlgmr.msra.gmra.mrb[10].mxu1 %vm1003_vm1, %v1025_v4 }
 0x5e0   : > { %v1095_v5 = vpop.f32.mrb[8].mxu1 }
 0x5e1   : > { %1172 = vst [vmem:[%s1804_s24] sm:$0xff] %v1095_v5  ;;  %v1398_v6 = vpop.f32.mrb[9].mxu1 }
 0x5e4   : > { %v1168_v7 = vpop.f32.mrb[10].mxu1 }
 0x5e5   : > { %1173 = vst [vmem:[%s1804_s24 + $0x8] sm:$0xff] %v1168_v7  ;;  %v1403_v8 = vpop.f32.mrb[11].mxu1 }
 0x5e6 PF: > { %s17_s30 = sadd.s32 1, %s1683_s30   ;;  %s2158_s24 = smov %s1663_s25 }
 0x5e7   : > { %p14_p0 = scmp.ge.s32.totalorder %s17_s30, 8   ;;  %s2159_s25 = smov %s1780_s14 }
 0x5e8   : > { %s2160_s26 = smov %s1675_s28  ;;  %s2161_s27 = smov %s1679_s29 }
 0x5e9   : > { %s2162_s28 = smov %s2165_s8  ;;  %s2163_s29 = smov %s2169_s9 }
 0x5ea   :  { %16 = sbr.rel (!%p14_p0) target bundleno = 4 (0x4), region = 132 }

</bundles_post_ra>
